<compile_context>
chip_gen: v5e
topology: v5e:2x2
jax: 0.10.0
libtpu: 0.0.40
codegen_flags: <defaults>
</compile_context>

<pallas_src>
import functools

import numpy as np
import jax
import jax.numpy as jnp
from jax.experimental import pallas as pl
from jax.experimental.pallas import tpu as pltpu


def _round_up(x, m):
    return ((x + m - 1) // m) * m


def _ceil_div(a, b):
    return -(-a // b)


@functools.lru_cache(maxsize=1)
def _tpu_config():
    """Returns (generation, two_tensorcores, vmem_cap_bytes)."""
    try:
        kind = jax.devices()[0].device_kind.lower()
    except Exception:
        kind = ""
    if "v7" in kind:
        return 7, True, 32 * 1024 * 1024    # 64 MiB physical/TC -> leave headroom
    if "v6" in kind:
        return 6, False, 64 * 1024 * 1024
    if "v5" in kind:
        return 5, False, 64 * 1024 * 1024
    return 0, False, 32 * 1024 * 1024       # unknown: conservative


# ----------------------------------------------------------------------------
# Pallas MXU matmul kernels (f32 VMEM accumulator, optional fused bias + ReLU)
# ----------------------------------------------------------------------------
def _mm_kernel(a_ref, b_ref, o_ref, acc_ref, *, relu):
    @pl.when(pl.program_id(2) == 0)
    def _():
        acc_ref[...] = jnp.zeros_like(acc_ref)

    acc_ref[...] += jnp.dot(a_ref[...], b_ref[...],
                            preferred_element_type=jnp.float32)

    @pl.when(pl.program_id(2) == pl.num_programs(2) - 1)
    def _():
        r = acc_ref[...]
        if relu:
            r = jnp.maximum(r, 0.0)
        o_ref[...] = r.astype(o_ref.dtype)


def _mm_bias_kernel(a_ref, b_ref, bias_ref, o_ref, acc_ref, *, relu):
    @pl.when(pl.program_id(2) == 0)
    def _():
        # Bias folded into the accumulator init: one broadcast on the first K
        # step, no epilogue add.  bias block is (bm, 1) -> per-row (channel).
        acc_ref[...] = jnp.zeros_like(acc_ref) + bias_ref[...]

    acc_ref[...] += jnp.dot(a_ref[...], b_ref[...],
                            preferred_element_type=jnp.float32)

    @pl.when(pl.program_id(2) == pl.num_programs(2) - 1)
    def _():
        r = acc_ref[...]
        if relu:
            r = jnp.maximum(r, 0.0)
        o_ref[...] = r.astype(o_ref.dtype)


def pallas_matmul(a, b, row_bias=None, relu=False, out_dtype=jnp.float32):
    """(M, K) @ (K, N) [+ row_bias (M,)] [+ ReLU] -> (M, N) in `out_dtype`.

    bf16 MXU inputs, f32 accumulation in a VMEM scratch.  Callers orient the
    GEMM so N (lane dim) is the large patch/pixel axis (lane-dense stores).
    Zero-padding of M/K/N (when tiles don't divide) is sliced off on return.
    """
    M, K = a.shape
    K2, N = b.shape
    assert K == K2
    gen, two_tc, vmem_cap = _tpu_config()

    a = a.astype(jnp.bfloat16)
    b = b.astype(jnp.bfloat16)

    # --- K (reduction): full extent if modest, else 512-wide tiles (zero-pad).
    if K <= 2048:
        bk, Kp = K, K
    else:
        bk = 512
        Kp = _round_up(K, bk)

    # --- N (lane dim of the output): keep it dense; tile only when large.
    if N <= 2048:
        bn, Np = N, N
    else:
        bn = 512
        Np = _round_up(N, bn)

    # --- M (sublane dim): multiples of 16 (bf16 packing).  Single big tile on
    # single-TC chips; even splits capped at 512 rows otherwise.
    bm_cap = 512
    m16 = _round_up(max(M, 1), 16)
    if m16 <= bm_cap:
        bm = m16
    else:
        n_steps = _ceil_div(m16, bm_cap)
        bm = _round_up(_ceil_div(M, n_steps), 16)
    Mp = _round_up(M, bm)
    # v7x: two TensorCores -> make sure there are >=2 parallel grid steps.
    if two_tc and (Mp // bm) * (Np // bn) < 2 and m16 > 16:
        bm = _round_up(_ceil_div(M, 2), 16)
        Mp = _round_up(M, bm)

    if (Mp, Kp) != (M, K):
        a = jnp.zeros((Mp, Kp), a.dtype).at[:M, :K].set(a)
    if (Kp, Np) != (K, N):
        b = jnp.zeros((Kp, Np), b.dtype).at[:K, :N].set(b)

    grid = (Mp // bm, Np // bn, Kp // bk)

    in_specs = [
        pl.BlockSpec((bm, bk), lambda i, j, kk: (i, kk)),
        pl.BlockSpec((bk, bn), lambda i, j, kk: (kk, j)),
    ]
    operands = [a, b]
    if row_bias is not None:
        bias2d = row_bias.astype(jnp.float32).reshape(M, 1)
        if Mp != M:
            bias2d = jnp.zeros((Mp, 1), jnp.float32).at[:M].set(bias2d)
        in_specs.append(pl.BlockSpec((bm, 1), lambda i, j, kk: (i, 0)))
        operands.append(bias2d)
        kernel = functools.partial(_mm_bias_kernel, relu=relu)
    else:
        kernel = functools.partial(_mm_kernel, relu=relu)

    out_bytes = jnp.dtype(out_dtype).itemsize
    vmem_need = (2 * (bm * bk * 2 + bk * bn * 2 + bm * 4 + bm * bn * out_bytes)
                 + bm * bn * 4)
    vmem_limit = int(min(vmem_cap, max(32 * 1024 * 1024, 2 * vmem_need)))

    out = pl.pallas_call(
        kernel,
        out_shape=jax.ShapeDtypeStruct((Mp, Np), out_dtype),
        grid=grid,
        in_specs=in_specs,
        out_specs=pl.BlockSpec((bm, bn), lambda i, j, kk: (i, j)),
        scratch_shapes=[pltpu.VMEM((bm, bn), jnp.float32)],
        compiler_params=pltpu.CompilerParams(
            dimension_semantics=("parallel", "parallel", "arbitrary"),
            vmem_limit_bytes=vmem_limit),
        cost_estimate=pl.CostEstimate(
            flops=2 * Mp * Np * Kp,
            transcendentals=0,
            bytes_accessed=(Mp * Kp * 2 * (Np // bn)     # A streamed per N tile
                            + Kp * Np * 2 * (Mp // bm)   # B streamed per M tile
                            + Mp * Np * out_bytes)),
    )(*operands)
    if (Mp, Np) != (M, N):
        out = out[:M, :N]
    return out


# ----------------------------------------------------------------------------
# Glue ops (channel-major im2col, bilinear / adaptive-pool operators)
# ----------------------------------------------------------------------------
def _im2col_T(x_cbhw, k, stride, pad):
    """Channel-major im2col: (C, B, H, W) -> (C, k*k, B, Ho, Wo), Ho, Wo.

    Row order (c, kh, kw) after flattening the first two dims matches both
    torch.nn.Unfold's channel flattening and w.reshape(Cout, Cin*k*k); the
    trailing (B, Ho, Wo) dims flatten into the lane-dense column axis with no
    transpose."""
    C, B, H, W = x_cbhw.shape
    Ho = (H + 2 * pad - k) // stride + 1
    Wo = (W + 2 * pad - k) // stride + 1
    xp = jnp.pad(x_cbhw, ((0, 0), (0, 0), (pad, pad), (pad, pad)))
    slabs = [xp[:, :, kh:kh + stride * Ho:stride, kw:kw + stride * Wo:stride]
             for kh in range(k) for kw in range(k)]       # each (C, B, Ho, Wo)
    cols = jnp.stack(slabs, axis=1)                        # (C, k*k, B, Ho, Wo)
    return cols, Ho, Wo


def _bilinear_weight_1d_np(in_size, out_size):
    """1-D weights of F.interpolate(mode='bilinear', align_corners=False) as an
    (in_size, out_size) matrix (numpy, host)."""
    scale = in_size / out_size
    dst = np.arange(out_size, dtype=np.float64)
    src = np.maximum((dst + 0.5) * scale - 0.5, 0.0)
    i0 = np.floor(src).astype(np.int64)
    i1 = np.minimum(i0 + 1, in_size - 1)
    w1 = src - i0
    w0 = 1.0 - w1
    W = np.zeros((in_size, out_size), dtype=np.float64)
    cols = dst.astype(np.int64)
    np.add.at(W, (i0, cols), w0)
    np.add.at(W, (i1, cols), w1)
    return W


def _adaptive_avg_pool_matrix_np(L, K):
    """F.adaptive_avg_pool1d(L -> K) semantics as an (L, K) linear map."""
    P = np.zeros((L, K), dtype=np.float64)
    for k in range(K):
        s = (k * L) // K
        e = -((-(k + 1) * L) // K)                # ceil((k+1)*L/K)
        P[s:e, k] = 1.0 / (e - s)
    return P


# ----------------------------------------------------------------------------
# The module
# ----------------------------------------------------------------------------
class PatchFeatureExtractorPallas:
    def __init__(self, key, in_channels=3, c2=16, c3=32,
                 flatten_dimension=32, out_dimension=32,
                 patchsize=3, patchstride=1):
        self.patchsize = patchsize
        self.patchstride = patchstride
        self.padding = (patchsize - 1) // 2
        self.flatten_dimension = flatten_dimension
        self.out_dimension = out_dimension
        self._pool_cache = {}
        self._resize_cache = {}
        # TODO(synk): the real module hooks layer2/layer3 of a pretrained
        # WideResNet-50; here a deterministic 2-conv stand-in produces feature
        # maps playing the same roles (successively strided, more channels).
        k1, k2, k3, k4 = jax.random.split(key, 4)
        w2 = 0.1 * jax.random.normal(k1, (c2, in_channels, 3, 3), jnp.float32)
        w3 = 0.1 * jax.random.normal(k3, (c3, c2, 3, 3), jnp.float32)
        # Weights pre-flattened (Cout, Cin*k*k): row order (ci, kh, kw) matches
        # the channel-major im2col rows.
        self.w2f = w2.reshape(c2, in_channels * 9)
        self.w3f = w3.reshape(c3, c2 * 9)
        self.b2 = 0.01 * jax.random.normal(k2, (c2,), jnp.float32)
        self.b3 = 0.01 * jax.random.normal(k4, (c3,), jnp.float32)

    # ---- conv + bias + ReLU, transposed / lane-dense ------------------------
    def _conv(self, x_cbhw, w_flat, bias, stride, pad):
        """(C, B, H, W) -> (Cout, B, Ho, Wo) bf16 via one Pallas matmul."""
        # TODO(synk): at real WideResNet sizes, replace the materialized im2col
        # with k*k shifted strided-view accumulation inside one pallas_call
        # (extra "arbitrary" grid axis over kh*kw) to avoid the 9x HBM blowup.
        C, B = x_cbhw.shape[0], x_cbhw.shape[1]
        cols, Ho, Wo = _im2col_T(x_cbhw, 3, stride, pad)
        a = cols.reshape(C * 9, B * Ho * Wo)
        y = pallas_matmul(w_flat, a, row_bias=bias, relu=True,
                          out_dtype=jnp.bfloat16)          # (Cout, B*Ho*Wo)
        return y.reshape(w_flat.shape[0], B, Ho, Wo)

    def _backbone(self, x_cbhw):
        layer2 = self._conv(x_cbhw, self.w2f, self.b2, stride=4, pad=1)
        layer3 = self._conv(layer2, self.w3f, self.b3, stride=2, pad=1)
        return [("layer2", layer2), ("layer3", layer3)]

    # ---- both adaptive_avg_pool1d stages as ONE (out_dim, sum_widths) op ----
    def _fused_pool_operator_T(self, widths):
        if widths not in self._pool_cache:
            fd = self.flatten_dimension
            blocks = [_adaptive_avg_pool_matrix_np(L, fd) for L in widths]
            total = sum(b.shape[0] for b in blocks)
            bd = np.zeros((total, fd * len(blocks)), dtype=np.float64)
            r = 0
            for i, blk in enumerate(blocks):
                bd[r:r + blk.shape[0], i * fd:(i + 1) * fd] = blk
                r += blk.shape[0]
            p_final = _adaptive_avg_pool_matrix_np(fd * len(blocks),
                                                   self.out_dimension)
            op_t = (bd @ p_final).T                        # (out_dim, sum_widths)
            self._pool_cache[widths] = jnp.asarray(op_t, dtype=jnp.float32)
        return self._pool_cache[widths]

    # ---- separable bilinear resize folded into one kron operator ------------
    def _kron_resize_op(self, nh, nw, Hr, Wr):
        key = (nh, nw, Hr, Wr)
        if key not in self._resize_cache:
            wh = _bilinear_weight_1d_np(nh, Hr)            # (nh, Hr)
            ww = _bilinear_weight_1d_np(nw, Wr)            # (nw, Wr)
            op = np.kron(wh, ww)                           # (nh*nw, Hr*Wr)
            self._resize_cache[key] = jnp.asarray(op, dtype=jnp.float32)
        return self._resize_cache[key]

    def __call__(self, images):
        # NCHW -> channel-major (C, B, H, W): the only layout transpose in the
        # pipeline, applied to the small raw input.
        x = jnp.transpose(images, (1, 0, 2, 3))
        B = images.shape[0]
        outputs = self._backbone(x)

        k = self.patchsize
        patches_per_layer = []
        widths = []
        ref_num_patches = None

        for output_index, (_name, f) in enumerate(outputs):
            C, _B, H, W = f.shape
            nh = (H + 2 * self.padding - (k - 1) - 1) // self.patchstride + 1
            nw = (W + 2 * self.padding - (k - 1) - 1) // self.patchstride + 1
            if output_index == 0:
                ref_num_patches = (nh, nw)
            Hr, Wr = ref_num_patches

            cols, _, _ = _im2col_T(f, k, self.patchstride, self.padding)
            # cols: (C, k*k, B, nh, nw)
            if (nh, nw) == (Hr, Wr):
                # Identity bilinear resize (reference layer): skip entirely.
                patches = cols.reshape(C * k * k, B * Hr * Wr)
            else:
                # One matmul against kron(Wh, Ww): rows = (c, kh, kw, b), lane
                # dim = Hr*Wr.  No intermediate transposes.
                kron_op = self._kron_resize_op(nh, nw, Hr, Wr)
                t = pallas_matmul(cols.reshape(C * k * k * B, nh * nw), kron_op,
                                  out_dtype=jnp.bfloat16)  # (C*k*k*B, Hr*Wr)
                patches = t.reshape(C * k * k, B * Hr * Wr)
            patches_per_layer.append(patches)
            widths.append(C * k * k)

        # Per-layer adaptive_avg_pool1d -> flatten_dim, stack(dim=1), reshape,
        # final adaptive_avg_pool1d -> out_dim: all linear, folded into one
        # (out_dim, sum_widths) operator and executed by ONE Pallas matmul with
        # a lane-dense (out_dim, B*Hr*Wr) output.
        pool_op_t = self._fused_pool_operator_T(tuple(widths))
        a = jnp.concatenate(patches_per_layer, axis=0)     # (sum_widths, N)
        feats_t = pallas_matmul(pool_op_t, a, out_dtype=jnp.float32)
        feats = feats_t.T                                  # (N, out_dim) API shape
        return feats, ref_num_patches


if __name__ == "__main__":
    key = jax.random.PRNGKey(0)
    kparams, kx = jax.random.split(key)
    model = PatchFeatureExtractorPallas(
        kparams, in_channels=3, c2=16, c3=32,
        flatten_dimension=32, out_dimension=32)
    images = jax.random.normal(kx, (2, 3, 16, 16), jnp.float32)

    feats, ref_num_patches = model(images)
    feats = jax.block_until_ready(feats)

    B = images.shape[0]
    expected_n = B * ref_num_patches[0] * ref_num_patches[1]
    assert feats.shape == (expected_n, model.out_dimension), feats.shape
    assert bool(jnp.all(jnp.isfinite(feats)))
    print("KERNEL_OK")
</pallas_src>

<mosaic_0001>
module attributes {stable_mosaic.version = 11 : i64} {
  func.func @_mm_bias_kernel(%arg0: i32, %arg1: i32, %arg2: i32, %arg3: memref<16x27xbf16, #tpu.memory_space<vmem>>, %arg4: memref<27x32xbf16, #tpu.memory_space<vmem>>, %arg5: memref<16x1xf32, #tpu.memory_space<vmem>>, %arg6: memref<16x32xbf16, #tpu.memory_space<vmem>>, %arg7: memref<16x32xf32, #tpu.memory_space<vmem>>) attributes {dimension_semantics = [#tpu.dimension_semantics<parallel>, #tpu.dimension_semantics<parallel>, #tpu.dimension_semantics<arbitrary>], iteration_bounds = array<i64: 1, 1, 1>, scalar_prefetch = 0 : i64, scratch_operands = 1 : i64, tpu.core_type = #tpu.core_type<tc>, window_params = [{transform_indices = @transform_0, window_bounds = array<i64: 16, 27>}, {transform_indices = @transform_1, window_bounds = array<i64: 27, 32>}, {transform_indices = @transform_2, window_bounds = array<i64: 16, 1>}, {transform_indices = @transform_3, window_bounds = array<i64: 16, 32>}]} {
    %c0_i32 = arith.constant 0 : i32
    %0 = arith.cmpi eq, %arg2, %c0_i32 : i32
    %1 = arith.extui %0 : i1 to i32
    %c0_i32_0 = arith.constant 0 : i32
    %2 = arith.cmpi ne, %1, %c0_i32_0 : i32
    scf.if %2 {
      %cst_10 = arith.constant 0.000000e+00 : f32
      %12 = vector.broadcast %cst_10 : f32 to vector<16x32xf32>
      %c0_11 = arith.constant 0 : index
      %c0_12 = arith.constant 0 : index
      %13 = vector.load %arg5[%c0_11, %c0_12] : memref<16x1xf32, #tpu.memory_space<vmem>>, vector<16x1xf32>
      %14 = vector.broadcast %13 : vector<16x1xf32> to vector<16x32xf32>
      %15 = arith.addf %12, %14 : vector<16x32xf32>
      %c0_13 = arith.constant 0 : index
      %c0_14 = arith.constant 0 : index
      %16 = vector.load %arg7[%c0_13, %c0_14] : memref<16x32xf32, #tpu.memory_space<vmem>>, vector<16x32xf32>
      tpu.vector_store %arg7[%c0_13, %c0_14], %15 {strides = array<i32>} : memref<16x32xf32, #tpu.memory_space<vmem>>, vector<16x32xf32>,
    } else {
    }
    %c0 = arith.constant 0 : index
    %c0_1 = arith.constant 0 : index
    %3 = vector.load %arg7[%c0, %c0_1] : memref<16x32xf32, #tpu.memory_space<vmem>>, vector<16x32xf32>
    %c0_2 = arith.constant 0 : index
    %c0_3 = arith.constant 0 : index
    %4 = vector.load %arg3[%c0_2, %c0_3] : memref<16x27xbf16, #tpu.memory_space<vmem>>, vector<16x27xbf16>
    %c0_4 = arith.constant 0 : index
    %c0_5 = arith.constant 0 : index
    %5 = vector.load %arg4[%c0_4, %c0_5] : memref<27x32xbf16, #tpu.memory_space<vmem>>, vector<27x32xbf16>
    %cst = arith.constant dense<0.000000e+00> : vector<16x32xf32>
    %6 = tpu.matmul %4, %5, %cst {dimension_numbers = #tpu.dot_dimension_numbers<[1], [0], [0], [1], [0, 0, 1, 1], [], []>} : vector<16x27xbf16>, vector<27x32xbf16>, vector<16x32xf32> -> vector<16x32xf32>
    %7 = arith.addf %3, %6 : vector<16x32xf32>
    %c0_6 = arith.constant 0 : index
    %c0_7 = arith.constant 0 : index
    %8 = vector.load %arg7[%c0_6, %c0_7] : memref<16x32xf32, #tpu.memory_space<vmem>>, vector<16x32xf32>
    tpu.vector_store %arg7[%c0_6, %c0_7], %7 {strides = array<i32>} : memref<16x32xf32, #tpu.memory_space<vmem>>, vector<16x32xf32>,
    %c0_i32_8 = arith.constant 0 : i32
    %9 = arith.cmpi eq, %arg2, %c0_i32_8 : i32
    %10 = arith.extui %9 : i1 to i32
    %c0_i32_9 = arith.constant 0 : i32
    %11 = arith.cmpi ne, %10, %c0_i32_9 : i32
    scf.if %11 {
      %c0_10 = arith.constant 0 : index
      %c0_11 = arith.constant 0 : index
      %12 = vector.load %arg7[%c0_10, %c0_11] : memref<16x32xf32, #tpu.memory_space<vmem>>, vector<16x32xf32>
      %cst_12 = arith.constant 0.000000e+00 : f32
      %13 = vector.broadcast %cst_12 : f32 to vector<16x32xf32>
      %14 = arith.maximumf %12, %13 : vector<16x32xf32>
      %15 = arith.truncf %14 : vector<16x32xf32> to vector<16x32xbf16>
      %c0_13 = arith.constant 0 : index
      %c0_14 = arith.constant 0 : index
      %16 = vector.load %arg6[%c0_13, %c0_14] : memref<16x32xbf16, #tpu.memory_space<vmem>>, vector<16x32xbf16>
      tpu.vector_store %arg6[%c0_13, %c0_14], %15 {strides = array<i32>} : memref<16x32xbf16, #tpu.memory_space<vmem>>, vector<16x32xbf16>,
    } else {
    }
    return
  }
  func.func @transform_0(%arg0: i32, %arg1: i32, %arg2: i32) -> (i32, i32) {
    %c0_i32 = arith.constant 0 : i32
    return %arg0, %arg2 : i32, i32
  }
  func.func @transform_1(%arg0: i32, %arg1: i32, %arg2: i32) -> (i32, i32) {
    %c0_i32 = arith.constant 0 : i32
    return %arg2, %arg1 : i32, i32
  }
  func.func @transform_2(%arg0: i32, %arg1: i32, %arg2: i32) -> (i32, i32) {
    %c0_i32 = arith.constant 0 : i32
    %c0_i32_0 = arith.constant 0 : i32
    return %arg0, %c0_i32 : i32, i32
  }
  func.func @transform_3(%arg0: i32, %arg1: i32, %arg2: i32) -> (i32, i32) {
    %c0_i32 = arith.constant 0 : i32
    return %arg0, %arg1 : i32, i32
  }
}

</mosaic_0001>

<bundles_post_ra>
// kernel: tpu_custom_call.1
= control target key start
LH: loop header
LB: loop body
LE: loop exit
PB: predicated region body
PF: predicated region fallthrough
CT: control target
= control target key end

     0   :  { %8 = vsyncpa [#allocation4], 0  ;;  %s266_s0 = inlined_call_operand.hbm [shape: bf16[16,27], index: 0, kind: input, shape index: {}]   ;;  %s267_s1 = inlined_call_operand.vmem [shape: bf16[27,32], index: 1, kind: input, shape index: {}]   ;;  %s268_s2 = inlined_call_operand.vmem [shape: f32[16,1], index: 2, kind: input, shape index: {}]   ;;  %s269_s3 = inlined_call_operand.hbm [shape: bf16[16,32], index: 3, kind: output, shape index: {}]  }
   0x1   :  { %9 = vsyncpa [#allocation5], 0  ;;  %s14_s14 = sshll.u32 %s266_s0, 4  ;;  %s213_s15 = smov [#allocation3]   ;;  %s15_s14 = int_to_ptr.hbm [resolvable:$true] %s14_s14 }
   0x2   :  { %s16_s16 = sshll.u32 %s213_s15, 4  ;;  %s214_s17 = smov 64   ;;  %s17_s16 = int_to_ptr.vmem [resolvable:$true] %s16_s16 }
   0x3   :  { %s215_s18 = smov 4  }
   0x4   :  { %22 = dma.hbm_to_vmem [thread:$0]  %s15_s14, 128, %s17_s16, [#allocation4], %s214_s17, %s214_s17, %s215_s18  }
   0x5   :  { %209 = dma.done.wait [#allocation4], 128  }
   0x6   :  { %210 = vsyncadd [#allocation4], 4294967168  ;;  %vm81_vm0 = vcmask 1044480   ;;  %v216_v0 = vmov 0   ;;  %vm82_vm1 = vcmask 1045504   ;;  %v217_v1 = vmov 65535  }
   0x7   :  { %160 = vset.pattern.permute.xlu0 %v216_v0  ;;  %v83_v2 = vsel %vm81_vm0, 4294967295, %v217_v1  ;;  %v148_v3 = vld [vmem:[%s267_s1 + $0x8] sm:$0xf]  ;;  %v153_v4 = vld [vmem:[%s267_s1 + $0x8] sm:$0x30]  ;;  %v36_v6 = vld [vmem:[%s268_s2] sm:$0xff] }
   0x8   :  { %v84_v5 = vsel %vm82_vm1, %v83_v2, 0  ;;  %v149_v7 = vor.u32 %v153_v4, %v148_v3  ;;  %40 = vperm.xlu0 %160, %v36_v6   ;;  %v152_v9 = vld [vmem:[%s267_s1] sm:$0xff]  ;;  %v37_v10 = vld [vmem:[%s268_s2 + $0x8] sm:$0xff]  ;;  %v151_v11 = vld [vmem:[#allocation3] sm:$0xff]  ;;  %vm77_vm2 = vcmask 220160   ;;  %vm50_vm3 = vcmask 261120  }
   0x9   :  { %vm116_vm4 = vcmask 257024   ;;  %s218_s1 = smov [#allocation6]   ;;  %s125_s30 = sshll.u32 %s269_s3, 4  ;;  %s126_s30 = int_to_ptr.hbm [resolvable:$true] %s125_s30 }
   0xa   :  { %v86_v8 = vand.u32 %v149_v7, %v84_v5  ;;  %s123_s2 = sshll.u32 %s218_s1, 4  ;;  %s124_s2 = int_to_ptr.vmem [resolvable:$true] %s123_s2 }
   0xc   :  { %94 = vmatpush.bf16.msra.mxu0 %v86_v8 }
  0x10   :  { %95 = vmatpush.bf16.msra.mxu0 %v152_v9  ;;  %45 = vperm.xlu0 %160, %v37_v10  }
  0x13   :  { %150 = vmatmul.msk.bf16.vlgmr.msra.gmra.mxu0 %vm77_vm2, %v151_v11 }
  0x7a   :  { %v41_v12 = vpop.permute.xlu0 %40 }
  0x7b   :  { %51 = vst.msk [vmem:[#allocation2] sm:$0xff] %vm50_vm3, %v41_v12 }
  0x82   :  { %v46_v13 = vpop.permute.xlu0 %45  ;;  %v53_v14 = vld [vmem:[#allocation2] sm:$0xff] }
  0x83   :  { %52 = vst.msk [vmem:[#allocation2 + $0x8] sm:$0xff] %vm50_vm3, %v46_v13 }
  0x8a   :  { %v54_v17 = vld [vmem:[#allocation2 + $0x8] sm:$0xff] }
  0x90   :  { %v97_v15 = vpop.f32.mrf.mxu0 }
  0x91   :  { %v102_v16 = vadd.f32 %v97_v15, %v53_v14 }
  0x93   :  { %105 = vst.msk [vmem:[#allocation2] sm:$0xff] %vm50_vm3, %v102_v16 }
  0x98   :  { %v99_v18 = vpop.f32.mrf.mxu0 }
  0x99   :  { %v103_v19 = vadd.f32 %v99_v18, %v54_v17 }
  0x9a   :  { %v110_v20 = vld [vmem:[#allocation2] sm:$0xff] }
  0x9b   :  { %106 = vst.msk [vmem:[#allocation2 + $0x8] sm:$0xff] %vm50_vm3, %v103_v19  ;;  %v112_v21 = vmax.f32 %v110_v20, 0.0 }
  0x9d   :  { %v114_v22 = vpack.c.bf16 %v112_v21, %v112_v21 }
  0x9f   :  { %117 = vst.msk [vmem:[#allocation6] sm:$0xf] %vm116_vm4, %v114_v22 }
  0xa2   :  { %v111_v23 = vld [vmem:[#allocation2 + $0x8] sm:$0xff] }
  0xa3   :  { %v113_v24 = vmax.f32 %v111_v23, 0.0 }
  0xa5   :  { %v115_v25 = vpack.c.bf16 %v113_v24, %v113_v24 }
  0xa7   :  { %118 = vst.msk [vmem:[#allocation6 + $0x4] sm:$0xf] %vm116_vm4, %v115_v25 }
  0xa8   :  { %131 = dma.vmem_to_hbm [thread:$0]  %s124_s2, 128, %s126_s30, [#allocation5], %s214_s17, %s214_s17, %s215_s18  }
  0xa9   :  { %211 = dma.done.wait [#allocation5], 128  }
  0xaa   :  { %212 = vsyncadd [#allocation5], 4294967168 }
  0xab   :  { %136 = vsyncpa [#allocation4], 1 }
  0xac   :  { %137 = vsyncpa [#allocation5], 1 }

</bundles_post_ra>
